<compile_context>
chip_gen: v7x
topology: tpu7x:2x2x1
jax: 0.10.0
libtpu: 0.0.40
codegen_flags: <defaults>
</compile_context>

<pallas_src>
import functools

import jax
import jax.numpy as jnp
from jax import lax
from jax.experimental import pallas as pl
from jax.experimental.pallas import tpu as pltpu


def fused_se_conv_bn_kernel(gate_ref, w_ref, x_ref, gamma_ref, beta_ref,
                            o_ref, *, eps, inv_hw):
    # gate_ref : (1, Cin)   pre-sigmoid gate (x363 flattened)
    # w_ref    : (tc, Cin)  1x1 conv weight tile (Cout split on the grid)
    # x_ref    : (Cin, HW)  activations, native NCHW order (N == 1); constant
    #                       block index -> DMA'd once, resident across steps
    # gamma_ref: (tc, 1)    BN weight tile
    # beta_ref : (tc, 1)    BN bias tile
    # o_ref    : (tc, HW)   output tile, already NCHW order

    # Sigmoid gate in f32 (EUP), cast once (1 x Cin) to the weight dtype, then
    # a single native-dtype multiply over the small per-tile weight matrix.
    g = jax.nn.sigmoid(gate_ref[...].astype(jnp.float32))            # (1, Cin)
    w_gated = w_ref[...] * g.astype(w_ref.dtype)                      # (tc, Cin)

    # 1x1 conv == matmul on the MXU, f32 accumulation.
    z = jnp.dot(w_gated.astype(x_ref.dtype), x_ref[...],
                preferred_element_type=jnp.float32)                   # (tc, HW)

    # BatchNorm2d (training mode): biased batch stats per output channel.
    # Channels are fully contained in this tile -> no cross-step accumulation.
    s1 = jnp.sum(z, axis=1, keepdims=True)                            # (tc, 1)
    s2 = jnp.sum(z * z, axis=1, keepdims=True)                        # (tc, 1)
    mean = s1 * inv_hw
    var = jnp.maximum(s2 * inv_hw - mean * mean, 0.0)   # clamp f32 cancellation
    inv_std = lax.rsqrt(var + eps)

    scale = inv_std * gamma_ref[...].astype(jnp.float32)              # (tc, 1)
    shift = beta_ref[...].astype(jnp.float32) - mean * scale          # (tc, 1)
    o_ref[...] = (z * scale + shift).astype(o_ref.dtype)


def _pick_cout_tile(cout):
    """Largest multiple of 8 that divides Cout, <= 128, preferring >= 2 grid
    steps (so weight-tile prefetch overlaps compute and both v7x TCs work)."""
    for t in range(min(cout - 1, 128), 7, -1):
        if cout % t == 0 and t % 8 == 0:
            return t
    return cout


def fused_se_conv_bn(x359, x363, conv_w, bn_gamma, bn_beta, *, eps=1e-3):
    """x359: (N, Cin, H, W), x363: (N, Cin, 1, 1), conv_w: (Cout, Cin, 1, 1)."""
    N, Cin, H, W = x359.shape
    assert N == 1, "fused_se_conv_bn: only N == 1 is supported (module spec)."
    Cout = conv_w.shape[0]
    HW = H * W
    tc = _pick_cout_tile(Cout)
    assert Cout % tc == 0

    # All of these are free reshapes (no transposes, no HBM round trips).
    x_mat = x359.reshape(Cin, HW)
    gate = x363.reshape(1, Cin)
    w_mat = conv_w.reshape(Cout, Cin)
    gamma = bn_gamma.reshape(Cout, 1)
    beta = bn_beta.reshape(Cout, 1)

    itemsize = jnp.dtype(x359.dtype).itemsize
    cost = pl.CostEstimate(
        flops=2 * Cout * Cin * HW,
        transcendentals=Cin + Cout,
        bytes_accessed=(Cin * HW + Cout * Cin + Cout * HW) * itemsize
                       + 2 * Cout * 4 + Cin * 4,
    )

    out = pl.pallas_call(
        functools.partial(fused_se_conv_bn_kernel, eps=eps, inv_hw=1.0 / HW),
        out_shape=jax.ShapeDtypeStruct((Cout, HW), x359.dtype),
        grid=(Cout // tc,),
        in_specs=[
            pl.BlockSpec((1, Cin), lambda i: (0, 0)),      # gate (resident)
            pl.BlockSpec((tc, Cin), lambda i: (i, 0)),     # weight tile
            pl.BlockSpec((Cin, HW), lambda i: (0, 0)),     # activations (resident)
            pl.BlockSpec((tc, 1), lambda i: (i, 0)),       # gamma tile
            pl.BlockSpec((tc, 1), lambda i: (i, 0)),       # beta tile
        ],
        out_specs=pl.BlockSpec((tc, HW), lambda i: (i, 0)),
        compiler_params=pltpu.CompilerParams(
            dimension_semantics=("parallel",)),
        cost_estimate=cost,
    )(gate, w_mat, x_mat, gamma, beta)

    # (Cout, HW) is already NCHW order for N == 1; reshape is free.
    return out.reshape(N, Cout, H, W)


def reference(x359, x363, conv_w, bn_gamma, bn_beta, eps=1e-3):
    x359 = x359.astype(jnp.float32)
    x363 = x363.astype(jnp.float32)
    conv_w = conv_w.astype(jnp.float32)
    bn_gamma = bn_gamma.astype(jnp.float32)
    bn_beta = bn_beta.astype(jnp.float32)
    gate = jax.nn.sigmoid(x363)
    y = gate * x359                                                  # (N,Cin,H,W)
    z = jnp.einsum('nchw,oc->nohw', y, conv_w.reshape(conv_w.shape[0], -1))
    mean = jnp.mean(z, axis=(0, 2, 3), keepdims=True)
    var = jnp.mean((z - mean) ** 2, axis=(0, 2, 3), keepdims=True)
    return (z - mean) * lax.rsqrt(var + eps) * bn_gamma.reshape(1, -1, 1, 1) \
           + bn_beta.reshape(1, -1, 1, 1)


if __name__ == "__main__":
    # Small shapes consistent with the module (1x1-conv SE block, 14x14
    # spatial; original Cin=1344, Cout=224 scaled down for the demo).
    # Cout=128 -> tile 64, grid=(2,) exercises the Cout split.
    N, Cin, Cout, H, W = 1, 256, 128, 14, 14
    eps = 1e-3

    key = jax.random.PRNGKey(0)
    k1, k2, k3, k4, k5 = jax.random.split(key, 5)
    x359 = jax.random.normal(k1, (N, Cin, H, W), dtype=jnp.float32)
    x363 = jax.random.normal(k2, (N, Cin, 1, 1), dtype=jnp.float32)
    conv_w = jax.random.normal(k3, (Cout, Cin, 1, 1), dtype=jnp.float32) * 0.05
    bn_gamma = 1.0 + 0.1 * jax.random.normal(k4, (Cout,), dtype=jnp.float32)
    bn_beta = 0.1 * jax.random.normal(k5, (Cout,), dtype=jnp.float32)

    # --- f32 path ---------------------------------------------------------
    out = fused_se_conv_bn(x359, x363, conv_w, bn_gamma, bn_beta, eps=eps)
    out = jax.block_until_ready(out)
    ref = reference(x359, x363, conv_w, bn_gamma, bn_beta, eps=eps)
    assert out.shape == (N, Cout, H, W)
    assert jnp.allclose(out, ref, atol=1e-4, rtol=1e-4), \
        float(jnp.max(jnp.abs(out - ref)))

    # --- bf16 path (production: MXU bf16-in / f32-accumulate) --------------
    # Compared against an f32 reference of the bf16-quantized inputs so the
    # tolerance only covers the kernel's own rounding (output cast to bf16).
    x359_b = x359.astype(jnp.bfloat16)
    x363_b = x363.astype(jnp.bfloat16)
    conv_w_b = conv_w.astype(jnp.bfloat16)
    gamma_b = bn_gamma.astype(jnp.bfloat16)
    beta_b = bn_beta.astype(jnp.bfloat16)
    out_b = fused_se_conv_bn(x359_b, x363_b, conv_w_b, gamma_b, beta_b, eps=eps)
    out_b = jax.block_until_ready(out_b)
    ref_b = reference(x359_b, x363_b, conv_w_b, gamma_b, beta_b, eps=eps)
    assert out_b.dtype == jnp.bfloat16
    assert jnp.allclose(out_b.astype(jnp.float32), ref_b, atol=3e-2, rtol=3e-2), \
        float(jnp.max(jnp.abs(out_b.astype(jnp.float32) - ref_b)))

    print("KERNEL_OK")
</pallas_src>

<mosaic_0001>
module attributes {stable_mosaic.version = 11 : i64} {
  func.func @fused_se_conv_bn_kernel(%arg0: i32, %arg1: memref<1x256xf32, #tpu.memory_space<vmem>>, %arg2: memref<64x256xf32, #tpu.memory_space<vmem>>, %arg3: memref<256x196xf32, #tpu.memory_space<vmem>>, %arg4: memref<64x1xf32, #tpu.memory_space<vmem>>, %arg5: memref<64x1xf32, #tpu.memory_space<vmem>>, %arg6: memref<64x196xf32, #tpu.memory_space<vmem>>) attributes {dimension_semantics = [#tpu.dimension_semantics<parallel>], iteration_bounds = array<i64: 2>, scalar_prefetch = 0 : i64, scratch_operands = 0 : i64, tpu.core_type = #tpu.core_type<tc>, window_params = [{pipeline_mode = #tpu.pipeline_mode<synchronous>, transform_indices = @transform_0, window_bounds = array<i64: 1, 256>}, {transform_indices = @transform_1, window_bounds = array<i64: 64, 256>}, {pipeline_mode = #tpu.pipeline_mode<synchronous>, transform_indices = @transform_2, window_bounds = array<i64: 256, 196>}, {transform_indices = @transform_3, window_bounds = array<i64: 64, 1>}, {transform_indices = @transform_4, window_bounds = array<i64: 64, 1>}, {transform_indices = @transform_5, window_bounds = array<i64: 64, 196>}]} {
    %c0 = arith.constant 0 : index
    %c0_0 = arith.constant 0 : index
    %0 = vector.load %arg1[%c0, %c0_0] : memref<1x256xf32, #tpu.memory_space<vmem>>, vector<1x256xf32>
    %1 = arith.negf %0 : vector<1x256xf32>
    %2 = math.exp %1 : vector<1x256xf32>
    %cst = arith.constant 1.000000e+00 : f32
    %3 = vector.broadcast %cst : f32 to vector<1x256xf32>
    %4 = arith.addf %3, %2 : vector<1x256xf32>
    %5 = arith.divf %3, %4 : vector<1x256xf32>
    %c0_1 = arith.constant 0 : index
    %c0_2 = arith.constant 0 : index
    %6 = vector.load %arg2[%c0_1, %c0_2] : memref<64x256xf32, #tpu.memory_space<vmem>>, vector<64x256xf32>
    %7 = vector.broadcast %5 : vector<1x256xf32> to vector<64x256xf32>
    %8 = arith.mulf %6, %7 : vector<64x256xf32>
    %c0_3 = arith.constant 0 : index
    %c0_4 = arith.constant 0 : index
    %9 = vector.load %arg3[%c0_3, %c0_4] : memref<256x196xf32, #tpu.memory_space<vmem>>, vector<256x196xf32>
    %cst_5 = arith.constant dense<0.000000e+00> : vector<64x196xf32>
    %10 = tpu.matmul %8, %9, %cst_5 {dimension_numbers = #tpu.dot_dimension_numbers<[1], [0], [0], [1], [0, 0, 1, 1], [], []>} : vector<64x256xf32>, vector<256x196xf32>, vector<64x196xf32> -> vector<64x196xf32>
    %cst_6 = arith.constant dense<0.000000e+00> : vector<64xf32>
    %11 = vector.multi_reduction <add>, %10, %cst_6 [1] : vector<64x196xf32> to vector<64xf32>
    %12 = vector.shape_cast %11 : vector<64xf32> to vector<64x1xf32>
    %13 = arith.mulf %10, %10 : vector<64x196xf32>
    %cst_7 = arith.constant dense<0.000000e+00> : vector<64xf32>
    %14 = vector.multi_reduction <add>, %13, %cst_7 [1] : vector<64x196xf32> to vector<64xf32>
    %15 = vector.shape_cast %14 : vector<64xf32> to vector<64x1xf32>
    %cst_8 = arith.constant 0.00510204071 : f32
    %16 = vector.broadcast %cst_8 : f32 to vector<64x1xf32>
    %17 = arith.mulf %12, %16 : vector<64x1xf32>
    %cst_9 = arith.constant 0.00510204071 : f32
    %18 = vector.broadcast %cst_9 : f32 to vector<64x1xf32>
    %19 = arith.mulf %15, %18 : vector<64x1xf32>
    %20 = arith.mulf %17, %17 : vector<64x1xf32>
    %21 = arith.subf %19, %20 : vector<64x1xf32>
    %cst_10 = arith.constant 0.000000e+00 : f32
    %22 = vector.broadcast %cst_10 : f32 to vector<64x1xf32>
    %23 = arith.maximumf %21, %22 : vector<64x1xf32>
    %cst_11 = arith.constant 1.000000e-03 : f32
    %24 = vector.broadcast %cst_11 : f32 to vector<64x1xf32>
    %25 = arith.addf %23, %24 : vector<64x1xf32>
    %26 = math.rsqrt %25 : vector<64x1xf32>
    %c0_12 = arith.constant 0 : index
    %c0_13 = arith.constant 0 : index
    %27 = vector.load %arg4[%c0_12, %c0_13] : memref<64x1xf32, #tpu.memory_space<vmem>>, vector<64x1xf32>
    %28 = arith.mulf %26, %27 : vector<64x1xf32>
    %c0_14 = arith.constant 0 : index
    %c0_15 = arith.constant 0 : index
    %29 = vector.load %arg5[%c0_14, %c0_15] : memref<64x1xf32, #tpu.memory_space<vmem>>, vector<64x1xf32>
    %30 = arith.mulf %17, %28 : vector<64x1xf32>
    %31 = arith.subf %29, %30 : vector<64x1xf32>
    %32 = vector.broadcast %28 : vector<64x1xf32> to vector<64x196xf32>
    %33 = arith.mulf %10, %32 : vector<64x196xf32>
    %34 = vector.broadcast %31 : vector<64x1xf32> to vector<64x196xf32>
    %35 = arith.addf %33, %34 : vector<64x196xf32>
    %c0_16 = arith.constant 0 : index
    %c0_17 = arith.constant 0 : index
    %36 = vector.load %arg6[%c0_16, %c0_17] : memref<64x196xf32, #tpu.memory_space<vmem>>, vector<64x196xf32>
    tpu.vector_store %arg6[%c0_16, %c0_17], %35 {strides = array<i32>} : memref<64x196xf32, #tpu.memory_space<vmem>>, vector<64x196xf32>,
    return
  }
  func.func @transform_0(%arg0: i32) -> (i32, i32) {
    %c0_i32 = arith.constant 0 : i32
    %c0_i32_0 = arith.constant 0 : i32
    %c0_i32_1 = arith.constant 0 : i32
    return %c0_i32, %c0_i32_0 : i32, i32
  }
  func.func @transform_1(%arg0: i32) -> (i32, i32) {
    %c0_i32 = arith.constant 0 : i32
    %c0_i32_0 = arith.constant 0 : i32
    return %arg0, %c0_i32 : i32, i32
  }
  func.func @transform_2(%arg0: i32) -> (i32, i32) {
    %c0_i32 = arith.constant 0 : i32
    %c0_i32_0 = arith.constant 0 : i32
    %c0_i32_1 = arith.constant 0 : i32
    return %c0_i32, %c0_i32_0 : i32, i32
  }
  func.func @transform_3(%arg0: i32) -> (i32, i32) {
    %c0_i32 = arith.constant 0 : i32
    %c0_i32_0 = arith.constant 0 : i32
    return %arg0, %c0_i32 : i32, i32
  }
  func.func @transform_4(%arg0: i32) -> (i32, i32) {
    %c0_i32 = arith.constant 0 : i32
    %c0_i32_0 = arith.constant 0 : i32
    return %arg0, %c0_i32 : i32, i32
  }
  func.func @transform_5(%arg0: i32) -> (i32, i32) {
    %c0_i32 = arith.constant 0 : i32
    %c0_i32_0 = arith.constant 0 : i32
    return %arg0, %c0_i32 : i32, i32
  }
}

</mosaic_0001>

<bundles_post_ra>
// kernel: tpu_custom_call.1
= control target key start
LH: loop header
LB: loop body
LE: loop exit
PB: predicated region body
PF: predicated region fallthrough
CT: control target
= control target key end

     0   :  { %s1077_s18 = smov 0   ;;  %s1531_s0 = inlined_call_operand.vmem [shape: f32[1,256], index: 0, kind: input, shape index: {}]   ;;  %s1532_s1 = inlined_call_operand.vmem [shape: f32[128,256], index: 1, kind: input, shape index: {}]   ;;  %s1533_s2 = inlined_call_operand.vmem [shape: f32[256,196], index: 2, kind: input, shape index: {}]   ;;  %s1534_s3 = inlined_call_operand.vmem [shape: f32[128,1], index: 3, kind: input, shape index: {}]   ;;  %s1535_s4 = inlined_call_operand.vmem [shape: f32[128,1], index: 4, kind: input, shape index: {}]   ;;  %s1536_s5 = inlined_call_operand.vmem [shape: f32[128,196], index: 5, kind: output, shape index: {}]  }
   0x1 LB: > { %s891_s19 = sadd.s32 4294967295, %s1044_s18   ;;  %p895_p0 = scmp.ge.s32.totalorder %s1044_s18, 1  ;;  %s1044_s18 = sphi %s1077_s18, %s15_s18  }
   0x2   : > { %p211_p1 = scmp.lt.s32.totalorder %s1044_s18, 3 }
   0x4   : > { %p212_p2 = pnand %p895_p0, %p211_p1 }
   0x5   : > { %v328_v0 = vld [vmem:[%s1533_s2 + $0x8] sm:$0xff] (!%p212_p2)  ;;  %v330_v1 = vld [vmem:[%s1533_s2 + $0x18] sm:$0xff] (!%p212_p2)  ;;  %v327_v2 = vld [vmem:[%s1533_s2] sm:$0xff] (!%p212_p2)  ;;  %s896_s29 = sshll.u32 (!%p212_p2), %s891_s19, 3  ;;  %vm504_vm0 = vcmask (!%p212_p2), 556032  }
   0x6   : > { %215 = sbr.rel (%p212_p2) target bundleno = 636 (0x27c), region = 40  ;;  %v911_v3 = vpack.c.bf16 (!%p212_p2), %v330_v1, %v328_v0  ;;  %v329_v4 = vld [vmem:[%s1533_s2 + $0x10] sm:$0xff] (!%p212_p2)  ;;  %v332_v5 = vld [vmem:[%s1533_s2 + $0x28] sm:$0xff] (!%p212_p2)  ;;  %v334_v6 = vld [vmem:[%s1533_s2 + $0x38] sm:$0xff] (!%p212_p2)  ;;  %p252_p3 = scmp.lt.s32.totalorder (!%p212_p2), %s896_s29, 15 }
   0x7   : > { %v913_v7 = vpack.c.bf16 (!%p212_p2), %v329_v4, %v327_v2  ;;  %v915_v8 = vpack.c.bf16 (!%p212_p2), %v334_v6, %v332_v5  ;;  %v331_v9 = vld [vmem:[%s1533_s2 + $0x20] sm:$0xff] (!%p212_p2)  ;;  %v333_v10 = vld [vmem:[%s1533_s2 + $0x30] sm:$0xff] (!%p212_p2)  ;;  %v336_v11 = vld [vmem:[%s1533_s2 + $0x48] sm:$0xff] (!%p212_p2)  ;;  %v301_v2 = vlaneseq (!%p212_p2) }
   0x8   : > { %912 = vmatprep.subr.bf16.mxu0 (!%p212_p2), %v911_v3  ;;  %975 = vmatprep.subr.bf16.mxu1 (!%p212_p2), %v911_v3  ;;  %v338_v12 = vld [vmem:[%s1533_s2 + $0x58] sm:$0xff] (!%p212_p2)  ;;  %v917_v13 = vpack.c.bf16 (!%p212_p2), %v333_v10, %v331_v9  ;;  %v335_v15 = vld [vmem:[%s1533_s2 + $0x40] sm:$0xff] (!%p212_p2)  ;;  %v337_v16 = vld [vmem:[%s1533_s2 + $0x50] sm:$0xff] (!%p212_p2) }
   0x9   : > { %914 = vmatpush1.bf16.msra.mxu0 (!%p212_p2), %v913_v7  ;;  %991 = vmatpush1.bf16.msra.mxu1 (!%p212_p2), %v913_v7  ;;  %v919_v14 = vpack.c.bf16 (!%p212_p2), %v338_v12, %v336_v11  ;;  %v340_v17 = vld [vmem:[%s1533_s2 + $0x68] sm:$0xff] (!%p212_p2)  ;;  %v342_v18 = vld [vmem:[%s1533_s2 + $0x78] sm:$0xff] (!%p212_p2)  ;;  %v921_v19 = vpack.c.bf16 (!%p212_p2), %v337_v16, %v335_v15  ;;  %v339_v21 = vld [vmem:[%s1533_s2 + $0x60] sm:$0xff] (!%p212_p2)  ;;  %v302_v9 = vshrl.u32 (!%p212_p2), %v301_v2, 7 }
   0xa   : > { %916 = vmatprep.subr.bf16.mxu0 (!%p212_p2), %v915_v8  ;;  %976 = vmatprep.subr.bf16.mxu1 (!%p212_p2), %v915_v8  ;;  %v923_v20 = vpack.c.bf16 (!%p212_p2), %v342_v18, %v340_v17  ;;  %v341_v22 = vld [vmem:[%s1533_s2 + $0x70] sm:$0xff] (!%p212_p2)  ;;  %v344_v23 = vld [vmem:[%s1533_s2 + $0x88] sm:$0xff] (!%p212_p2)  ;;  %v346_v24 = vld [vmem:[%s1533_s2 + $0x98] sm:$0xff] (!%p212_p2) }
   0xb   : > { %v925_v25 = vpack.c.bf16 (!%p212_p2), %v341_v22, %v339_v21  ;;  %v927_v26 = vpack.c.bf16 (!%p212_p2), %v346_v24, %v344_v23  ;;  %v343_v27 = vld [vmem:[%s1533_s2 + $0x80] sm:$0xff] (!%p212_p2)  ;;  %v345_v28 = vld [vmem:[%s1533_s2 + $0x90] sm:$0xff] (!%p212_p2)  ;;  %v348_v29 = vld [vmem:[%s1533_s2 + $0xa8] sm:$0xff] (!%p212_p2)  ;;  %v307_v16 = vsub.s32 (!%p212_p2), 1, %v302_v9 }
   0xc   : > { %v350_v30 = vld [vmem:[%s1533_s2 + $0xb8] sm:$0xff] (!%p212_p2)  ;;  %v929_v31 = vpack.c.bf16 (!%p212_p2), %v345_v28, %v343_v27  ;;  %v347_v33 = vld [vmem:[%s1533_s2 + $0xa0] sm:$0xff] (!%p212_p2)  ;;  %v349_v34 = vld [vmem:[%s1533_s2 + $0xb0] sm:$0xff] (!%p212_p2) }
   0xd   : > { %918 = vmatpush1.bf16.msra.mxu0 %v917_v13  ;;  %992 = vmatpush1.bf16.msra.mxu1 %v917_v13  ;;  %v931_v32 = vpack.c.bf16 %v350_v30, %v348_v29  ;;  %v352_v35 = vld [vmem:[%s1533_s2 + $0xc8] sm:$0xff]  ;;  %v354_v36 = vld [vmem:[%s1533_s2 + $0xd8] sm:$0xff]  ;;  %v933_v37 = vpack.c.bf16 %v349_v34, %v347_v33  ;;  %v351_v39 = vld [vmem:[%s1533_s2 + $0xc0] sm:$0xff]  ;;  %s1538_s29 = smov (!%p252_p3, %s896_s29), 15 }
   0xe   : > { %920 = vmatprep.subr.bf16.mxu0 %v919_v14  ;;  %977 = vmatprep.subr.bf16.mxu1 %v919_v14  ;;  %v935_v38 = vpack.c.bf16 %v354_v36, %v352_v35  ;;  %v353_v40 = vld [vmem:[%s1533_s2 + $0xd0] sm:$0xff]  ;;  %v277_v41 = vld [vmem:[%s1531_s0] sm:$0x3]  ;;  %v356_v42 = vld [vmem:[%s1533_s2 + $0xe8] sm:$0xff]  ;;  %s909_s26 = sshll.u32 %s1538_s29, 4 }
   0xf   : > { %v358_v43 = vld [vmem:[%s1533_s2 + $0xf8] sm:$0xff]  ;;  %v906_v44 = vmul.f32 -1.442695, %v277_v41  ;;  %v937_v45 = vpack.c.bf16 %v353_v40, %v351_v39  ;;  %v355_v47 = vld [vmem:[%s1533_s2 + $0xe0] sm:$0xff]  ;;  %v357_v48 = vld [vmem:[%s1533_s2 + $0xf0] sm:$0xff]  ;;  %s1249_s9 = scalar_lea.vmem %s1532_s1, %s909_s26  ;;  %v303_v40 = vsub.s32 0, %v302_v9  ;;  %s1488_s27 = scalar_lea.vmem %s1536_s5, %s909_s26 }
  0x10   : > { %v939_v46 = vpack.c.bf16 %v358_v43, %v356_v42  ;;  %v360_v49 = vld [vmem:[%s1533_s2 + $0x108] sm:$0xff]  ;;  %v362_v50 = vld [vmem:[%s1533_s2 + $0x118] sm:$0xff]  ;;  %v941_v51 = vpack.c.bf16 %v357_v48, %v355_v47  ;;  %v359_v53 = vld [vmem:[%s1533_s2 + $0x100] sm:$0xff] }
  0x11   : > { %922 = vmatpush1.bf16.msra.mxu0 %v921_v19  ;;  %993 = vmatpush1.bf16.msra.mxu1 %v921_v19  ;;  %1018 = vpow2.f32 %v906_v44  ;;  %v943_v52 = vpack.c.bf16 %v362_v50, %v360_v49  ;;  %v361_v54 = vld [vmem:[%s1533_s2 + $0x110] sm:$0xff]  ;;  %v364_v55 = vld [vmem:[%s1533_s2 + $0x128] sm:$0xff]  ;;  %v366_v56 = vld [vmem:[%s1533_s2 + $0x138] sm:$0xff] }
  0x12   : > { %924 = vmatprep.subr.bf16.mxu0 %v923_v20  ;;  %978 = vmatprep.subr.bf16.mxu1 %v923_v20  ;;  %v945_v57 = vpack.c.bf16 %v361_v54, %v359_v53  ;;  %v947_v58 = vpack.c.bf16 %v366_v56, %v364_v55  ;;  %v363_v59 = vld [vmem:[%s1533_s2 + $0x120] sm:$0xff]  ;;  %v365_v60 = vld [vmem:[%s1533_s2 + $0x130] sm:$0xff]  ;;  %v368_v62 = vld [vmem:[%s1533_s2 + $0x148] sm:$0xff] }
  0x13   : > { %v370_v63 = vld [vmem:[%s1533_s2 + $0x158] sm:$0xff]  ;;  %v949_v1 = vpack.c.bf16 %v365_v60, %v363_v59  ;;  %v367_v4 = vld [vmem:[%s1533_s2 + $0x140] sm:$0xff]  ;;  %v369_v5 = vld [vmem:[%s1533_s2 + $0x150] sm:$0xff] }
  0x14   : > { %v951_v3 = vpack.c.bf16 %v370_v63, %v368_v62  ;;  %v372_v6 = vld [vmem:[%s1533_s2 + $0x168] sm:$0xff]  ;;  %v374_v7 = vld [vmem:[%s1533_s2 + $0x178] sm:$0xff]  ;;  %v953_v8 = vpack.c.bf16 %v369_v5, %v367_v4  ;;  %v371_v11 = vld [vmem:[%s1533_s2 + $0x160] sm:$0xff] }
  0x15   : > { %926 = vmatpush1.bf16.msra.mxu0 %v925_v25  ;;  %994 = vmatpush1.bf16.msra.mxu1 %v925_v25  ;;  %v955_v10 = vpack.c.bf16 %v374_v7, %v372_v6  ;;  %v373_v12 = vld [vmem:[%s1533_s2 + $0x170] sm:$0xff]  ;;  %v376_v13 = vld [vmem:[%s1533_s2 + $0x188] sm:$0xff]  ;;  %v378_v14 = vld [vmem:[%s1533_s2 + $0x198] sm:$0xff] }
  0x16   : > { %928 = vmatprep.subr.bf16.mxu0 %v927_v26  ;;  %979 = vmatprep.subr.bf16.mxu1 %v927_v26  ;;  %v957_v15 = vpack.c.bf16 %v373_v12, %v371_v11  ;;  %v959_v17 = vpack.c.bf16 %v378_v14, %v376_v13  ;;  %v375_v18 = vld [vmem:[%s1533_s2 + $0x180] sm:$0xff]  ;;  %v377_v19 = vld [vmem:[%s1533_s2 + $0x190] sm:$0xff]  ;;  %v380_v20 = vld [vmem:[%s1533_s2 + $0x1a8] sm:$0xff] }
  0x17   : > { %v382_v21 = vld [vmem:[%s1533_s2 + $0x1b8] sm:$0xff]  ;;  %v285_v23 = vld [vmem:[%s1249_s9 + $0x8] sm:$0xff]  ;;  %v961_v25 = vpack.c.bf16 %v377_v19, %v375_v18  ;;  %v379_v28 = vld [vmem:[%s1533_s2 + $0x1a0] sm:$0xff] }
  0x18   : > { %v293_v24 = vld [vmem:[%s1249_s9 + $0x48] sm:$0xff]  ;;  %v963_v27 = vpack.c.bf16 %v382_v21, %v380_v20  ;;  %v381_v29 = vld [vmem:[%s1533_s2 + $0x1b0] sm:$0xff]  ;;  %v383_v36 = vld [vmem:[%s1533_s2 + $0x1c0] sm:$0xff] }
  0x19   : > { %930 = vmatpush1.bf16.msra.mxu0 %v929_v31  ;;  %995 = vmatpush1.bf16.msra.mxu1 %v929_v31  ;;  %v384_v30 = vld [vmem:[%s1533_s2 + $0x1c8] sm:$0xff]  ;;  %v386_v31 = vld [vmem:[%s1533_s2 + $0x1d8] sm:$0xff]  ;;  %v965_v34 = vpack.c.bf16 %v381_v29, %v379_v28  ;;  %v387_v43 = vld [vmem:[%s1533_s2 + $0x1e0] sm:$0xff] }
  0x1a   : > { %932 = vmatprep.subr.bf16.mxu0 %v931_v32  ;;  %980 = vmatprep.subr.bf16.mxu1 %v931_v32  ;;  %v967_v35 = vpack.c.bf16 %v386_v31, %v384_v30  ;;  %v390_v39 = vld [vmem:[%s1533_s2 + $0x1f8] sm:$0xff]  ;;  %v389_v44 = vld [vmem:[%s1533_s2 + $0x1f0] sm:$0xff]  ;;  %v284_v47 = vld [vmem:[%s1249_s9] sm:$0xff] }
  0x1b   : > { %v1019_v61 = vpop.eup %1018  ;;  %v292_v48 = vld [vmem:[%s1249_s9 + $0x40] sm:$0xff]  ;;  %v295_v49 = vld [vmem:[%s1249_s9 + $0x58] sm:$0xff]  ;;  %v294_v54 = vld [vmem:[%s1249_s9 + $0x50] sm:$0xff] }
  0x1c   : > { %v281_v0 = vadd.f32 1.0, %v1019_v61  ;;  %v287_v50 = vld [vmem:[%s1249_s9 + $0x18] sm:$0xff]  ;;  %v286_v56 = vld [vmem:[%s1249_s9 + $0x10] sm:$0xff]  ;;  %v288_v62 = vld [vmem:[%s1249_s9 + $0x20] sm:$0xff] }
  0x1d   : > { %934 = vmatpush1.bf16.msra.mxu0 %v933_v37  ;;  %996 = vmatpush1.bf16.msra.mxu1 %v933_v37  ;;  %v385_v37 = vld [vmem:[%s1533_s2 + $0x1d0] sm:$0xff]  ;;  %v299_v2 = vld [vmem:[%s1249_s9 + $0x78] sm:$0xff] }
  0x1e   : > { %936 = vmatprep.subr.bf16.mxu0 %v935_v38  ;;  %981 = vmatprep.subr.bf16.mxu1 %v935_v38  ;;  %1020 = vrcp.f32 %v281_v0  ;;  %v388_v38 = vld [vmem:[%s1533_s2 + $0x1e8] sm:$0xff]  ;;  %v969_v41 = vpack.c.bf16 %v385_v37, %v383_v36  ;;  %v296_v0 = vld [vmem:[%s1249_s9 + $0x60] sm:$0xff]  ;;  %v290_v6 = vld [vmem:[%s1249_s9 + $0x30] sm:$0xff] }
  0x1f   : > { %v971_v42 = vpack.c.bf16 %v390_v39, %v388_v38 }
  0x21   : > { %938 = vmatpush1.bf16.msra.mxu0 %v937_v45  ;;  %997 = vmatpush1.bf16.msra.mxu1 %v937_v45 }
  0x22   : > { %940 = vmatprep.subr.bf16.mxu0 %v939_v46  ;;  %982 = vmatprep.subr.bf16.mxu1 %v939_v46  ;;  %v973_v46 = vpack.c.bf16 %v389_v44, %v387_v43 }
  0x25   : > { %942 = vmatpush1.bf16.msra.mxu0 %v941_v51  ;;  %998 = vmatpush1.bf16.msra.mxu1 %v941_v51 }
  0x26   : > { %944 = vmatprep.subr.bf16.mxu0 %v943_v52  ;;  %983 = vmatprep.subr.bf16.mxu1 %v943_v52 }
  0x28   : > { %v1021_v22 = vpop.eup %1020 }
  0x29   : > { %946 = vmatpush1.bf16.msra.mxu0 %v945_v57  ;;  %999 = vmatpush1.bf16.msra.mxu1 %v945_v57  ;;  %v1265_v26 = vrot.slane %v1021_v22, %v307_v16  ;;  %v304_v45 = vrot.slane %v1021_v22, %v303_v40  ;;  %v289_v57 = vld [vmem:[%s1249_s9 + $0x28] sm:$0xff] }
  0x2a   : > { %948 = vmatprep.subr.bf16.mxu0 %v947_v58  ;;  %984 = vmatprep.subr.bf16.mxu1 %v947_v58  ;;  %v297_v58 = vld [vmem:[%s1249_s9 + $0x68] sm:$0xff] }
  0x2b   : > { %v312_v32 = vmul.f32 %v1265_v26, %v285_v23  ;;  %v320_v33 = vmul.f32 %v1265_v26, %v293_v24  ;;  %v311_v51 = vmul.f32 %v304_v45, %v284_v47  ;;  %v319_v52 = vmul.f32 %v304_v45, %v292_v48 }
  0x2c   : > { %v322_v53 = vmul.f32 %v1265_v26, %v295_v49  ;;  %v314_v55 = vmul.f32 %v1265_v26, %v287_v50  ;;  %v321_v59 = vmul.f32 %v304_v45, %v294_v54  ;;  %v313_v60 = vmul.f32 %v304_v45, %v286_v56 }
  0x2d   : > { %950 = vmatpush1.bf16.msra.mxu0 %v949_v1  ;;  %1000 = vmatpush1.bf16.msra.mxu1 %v949_v1  ;;  %v316_v61 = vmul.f32 %v1265_v26, %v289_v57  ;;  %v324_v63 = vmul.f32 %v1265_v26, %v297_v58  ;;  %v291_v1 = vld [vmem:[%s1249_s9 + $0x38] sm:$0xff]  ;;  %v323_v4 = vmul.f32 %v304_v45, %v296_v0 }
  0x2e   : > { %952 = vmatprep.subr.bf16.mxu0 %v951_v3  ;;  %985 = vmatprep.subr.bf16.mxu1 %v951_v3  ;;  %v315_v3 = vmul.f32 %v304_v45, %v288_v62  ;;  %v318_v5 = vmul.f32 %v1265_v26, %v291_v1  ;;  %v326_v7 = vmul.f32 %v1265_v26, %v299_v2 }
  0x2f   : > { %455 = vmatprep.mubr.f32.mxu0 %v312_v32  ;;  %479 = vmatprep.mubr.f32.mxu1 %v320_v33  ;;  %v317_v9 = vmul.f32 %v304_v45, %v290_v6 }
  0x31   : > { %954 = vmatpush1.bf16.msra.mxu0 %v953_v8  ;;  %1001 = vmatpush1.bf16.msra.mxu1 %v953_v8  ;;  %v298_v8 = vld [vmem:[%s1249_s9 + $0x70] sm:$0xff]  ;;  %s900_s9 = sshll.u32 %s1538_s29, 3 }
  0x32   : > { %956 = vmatprep.subr.bf16.mxu0 %v955_v10  ;;  %986 = vmatprep.subr.bf16.mxu1 %v955_v10  ;;  %v325_v10 = vmul.f32 %v304_v45, %v298_v8  ;;  %s1435_s20 = scalar_lea.vmem %s1534_s3, %s900_s9  ;;  %s1460_s23 = scalar_lea.vmem %s1535_s4, %s900_s9 }
  0x35   : > { %958 = vmatpush1.bf16.msra.mxu0 %v957_v15  ;;  %1002 = vmatpush1.bf16.msra.mxu1 %v957_v15 }
  0x36   : > { %960 = vmatprep.subr.bf16.mxu0 %v959_v17  ;;  %987 = vmatprep.subr.bf16.mxu1 %v959_v17 }
  0x39   : > { %962 = vmatpush1.bf16.msra.mxu0 %v961_v25  ;;  %1003 = vmatpush1.bf16.msra.mxu1 %v961_v25 }
  0x3a   : > { %964 = vmatprep.subr.bf16.mxu0 %v963_v27  ;;  %988 = vmatprep.subr.bf16.mxu1 %v963_v27 }
  0x3d   : > { %966 = vmatpush1.bf16.msra.mxu0 %v965_v34  ;;  %1004 = vmatpush1.bf16.msra.mxu1 %v965_v34 }
  0x3e   : > { %968 = vmatprep.subr.bf16.mxu0 %v967_v35  ;;  %989 = vmatprep.subr.bf16.mxu1 %v967_v35 }
  0x41   : > { %970 = vmatpush1.bf16.msra.mxu0 %v969_v41  ;;  %1005 = vmatpush1.bf16.msra.mxu1 %v969_v41 }
  0x42   : > { %972 = vmatprep.subr.bf16.mxu0 %v971_v42  ;;  %990 = vmatprep.subr.bf16.mxu1 %v971_v42 }
  0x45   : > { %974 = vmatpush1.bf16.msra.mxu0 %v973_v46  ;;  %1006 = vmatpush1.bf16.msra.mxu1 %v973_v46 }
  0x48   : > { %456 = vmatmul.mubr.f32.vlgmr.msra.gmra.mrb[0].mxu0 %v311_v51  ;;  %480 = vmatmul.mubr.f32.vlgmr.msra.gmra.mrb[0].mxu1 %v319_v52 }
  0x49   : > { %485 = vmatprep.mubr.f32.mxu1 %v322_v53  ;;  %461 = vmatprep.mubr.f32.mxu0 %v314_v55 }
  0x4c   : > { %486 = vmatmul.mubr.f32.gmra.mrb[2].mxu1 %v321_v59  ;;  %462 = vmatmul.mubr.f32.gmra.mrb[2].mxu0 %v313_v60 }
  0x4d   : > { %467 = vmatprep.mubr.f32.mxu0 %v316_v61  ;;  %491 = vmatprep.mubr.f32.mxu1 %v324_v63 }
  0x50   : > { %468 = vmatmul.mubr.f32.gmra.mrb[4].mxu0 %v315_v3  ;;  %492 = vmatmul.mubr.f32.gmra.mrb[4].mxu1 %v323_v4 }
  0x51   : > { %473 = vmatprep.mubr.f32.mxu0 %v318_v5  ;;  %497 = vmatprep.mubr.f32.mxu1 %v326_v7 }
  0x54   : > { %474 = vmatmul.mubr.f32.gmra.mrb[6].mxu0 %v317_v9  ;;  %498 = vmatmul.mubr.f32.gmra.mrb[6].mxu1 %v325_v10 }
 0x11b   : > { %v1319_v11 = vpop.f32.mrb[0].mxu0  ;;  %v1321_v12 = vpop.f32.mrb[0].mxu1 }
 0x11c   : > { %v1323_v13 = vpop.f32.mrb[1].mxu0  ;;  %v1325_v14 = vpop.f32.mrb[1].mxu1  ;;  %v545_v15 = vmul.f32 %v1321_v12, %v1321_v12  ;;  %v537_v22 = vmul.f32 %v1319_v11, %v1319_v11 }
 0x11d   : > { %v538_v16 = vmul.f32 %v1323_v13, %v1323_v13  ;;  %v546_v17 = vmul.f32 %v1325_v14, %v1325_v14  ;;  %v505_v18 = vsel %vm504_vm0, %v1323_v13, 0.0  ;;  %v521_v19 = vsel %vm504_vm0, %v1325_v14, 0.0 }
 0x11e   : > { %v506_v20 = vadd.f32 %v505_v18, %v1319_v11  ;;  %v522_v21 = vadd.f32 %v521_v19, %v1321_v12 }
 0x11f   : > { %v1341_v23 = vpop.f32.mrb[2].mxu1  ;;  %v1343_v24 = vpop.f32.mrb[2].mxu0  ;;  %v553_v25 = vsel %vm504_vm0, %v538_v16, 0.0  ;;  %v569_v26 = vsel %vm504_vm0, %v546_v17, 0.0 }
 0x120   : > { %v1347_v27 = vpop.f32.mrb[3].mxu1  ;;  %507 = vadd.xlane.f32.xlu0 %v506_v20  ;;  %v1349_v28 = vpop.f32.mrb[3].mxu0  ;;  %v554_v29 = vadd.f32 %v553_v25, %v537_v22  ;;  %v539_v30 = vmul.f32 %v1343_v24, %v1343_v24  ;;  %v570_v31 = vadd.f32 %v569_v26, %v545_v15  ;;  %v547_v32 = vmul.f32 %v1341_v23, %v1341_v23 }
 0x121   : > { %v548_v33 = vmul.f32 %v1347_v27, %v1347_v27  ;;  %v540_v34 = vmul.f32 %v1349_v28, %v1349_v28  ;;  %v525_v35 = vsel %vm504_vm0, %v1347_v27, 0.0  ;;  %v509_v36 = vsel %vm504_vm0, %v1349_v28, 0.0 }
 0x122   : > { %v526_v37 = vadd.f32 %v525_v35, %v1341_v23  ;;  %v510_v38 = vadd.f32 %v509_v36, %v1343_v24  ;;  %v1046_v15 = vmov 0  }
 0x123   : > { %v557_v39 = vsel %vm504_vm0, %v540_v34, 0.0  ;;  %v1366_v40 = vpop.f32.mrb[4].mxu0  ;;  %v573_v41 = vsel %vm504_vm0, %v548_v33, 0.0  ;;  %v1369_v42 = vpop.f32.mrb[4].mxu1  ;;  %1016 = vset.pattern.permute.xlu0 %v1046_v15  ;;  %1017 = vset.pattern.permute.xlu1 %v1046_v15 }
 0x124   : > { %527 = vadd.xlane.f32.xlu1 %v526_v37  ;;  %523 = vadd.xlane.f32.xlu0 %v522_v21  ;;  %v558_v43 = vadd.f32 %v557_v39, %v539_v30  ;;  %v574_v44 = vadd.f32 %v573_v41, %v547_v32  ;;  %v1371_v45 = vpop.f32.mrb[5].mxu0  ;;  %v1373_v46 = vpop.f32.mrb[5].mxu1  ;;  %v541_v47 = vmul.f32 %v1366_v40, %v1366_v40 }
 0x125   : > { %v542_v48 = vmul.f32 %v1371_v45, %v1371_v45  ;;  %v550_v49 = vmul.f32 %v1373_v46, %v1373_v46  ;;  %v513_v50 = vsel %vm504_vm0, %v1371_v45, 0.0  ;;  %v529_v51 = vsel %vm504_vm0, %v1373_v46, 0.0 }
 0x126   : > { %v514_v52 = vadd.f32 %v513_v50, %v1366_v40  ;;  %v530_v53 = vadd.f32 %v529_v51, %v1369_v42  ;;  %v549_v54 = vmul.f32 %v1369_v42, %v1369_v42 }
 0x127   : > { %v1389_v55 = vpop.f32.mrb[6].mxu0  ;;  %v1391_v56 = vpop.f32.mrb[6].mxu1  ;;  %v561_v57 = vsel %vm504_vm0, %v542_v48, 0.0  ;;  %v577_v58 = vsel %vm504_vm0, %v550_v49, 0.0 }
 0x128   : > { %555 = vadd.xlane.f32.xlu0 %v554_v29  ;;  %559 = vadd.xlane.f32.xlu1 %v558_v43  ;;  %v1395_v59 = vpop.f32.mrb[7].mxu0  ;;  %v1397_v60 = vpop.f32.mrb[7].mxu1  ;;  %v562_v61 = vadd.f32 %v561_v57, %v541_v47  ;;  %v578_v62 = vadd.f32 %v577_v58, %v549_v54  ;;  %v543_v63 = vmul.f32 %v1389_v55, %v1389_v55 }
 0x129   : > { %v517_v0 = vsel %vm504_vm0, %v1395_v59, 0.0  ;;  %v544_v1 = vmul.f32 %v1395_v59, %v1395_v59  ;;  %v533_v2 = vsel %vm504_vm0, %v1397_v60, 0.0  ;;  %v552_v3 = vmul.f32 %v1397_v60, %v1397_v60 }
 0x12a   : > { %v518_v4 = vadd.f32 %v517_v0, %v1389_v55  ;;  %v534_v5 = vadd.f32 %v533_v2, %v1391_v56  ;;  %v551_v6 = vmul.f32 %v1391_v56, %v1391_v56 }
 0x12b   : > { %v565_v7 = vsel %vm504_vm0, %v544_v1, 0.0  ;;  %v581_v8 = vsel %vm504_vm0, %v552_v3, 0.0  ;;  %v641_v3 = vld [vmem:[%s1435_s20] sm:$0xff] }
 0x12c   : > { %571 = vadd.xlane.f32.xlu0 %v570_v31  ;;  %575 = vadd.xlane.f32.xlu1 %v574_v44  ;;  %v566_v9 = vadd.f32 %v565_v7, %v543_v63  ;;  %v582_v10 = vadd.f32 %v581_v8, %v551_v6 }
 0x130   : > { %511 = vadd.xlane.f32.xlu0 %v510_v38  ;;  %515 = vadd.xlane.f32.xlu1 %v514_v52 }
 0x134   : > { %531 = vadd.xlane.f32.xlu0 %v530_v53  ;;  %519 = vadd.xlane.f32.xlu1 %v518_v4 }
 0x138   : > { %563 = vadd.xlane.f32.xlu0 %v562_v61  ;;  %535 = vadd.xlane.f32.xlu1 %v534_v5 }
 0x13c   : > { %579 = vadd.xlane.f32.xlu0 %v578_v62  ;;  %567 = vadd.xlane.f32.xlu1 %v566_v9 }
 0x140   : > { %583 = vadd.xlane.f32.xlu1 %v582_v10 }
 0x1ad   : > { %v508_v16 = vpop.xlane.xlu0 %507 }
 0x1ae   : > { %v1415_v19 = vmul.f32 0.0051020407, %v508_v16 }
 0x1b0   : > { %v601_v25 = vmul.f32 %v1415_v19, %v1415_v19 }
 0x1b1   : > { %v528_v17 = vpop.xlane.xlu1 %527  ;;  %v524_v18 = vpop.xlane.xlu0 %523 }
 0x1b2   : > { %v1417_v20 = vmul.f32 0.0051020407, %v528_v17  ;;  %v1421_v26 = vmul.f32 0.0051020407, %v524_v18 }
 0x1b4   : > { %v606_v30 = vmul.f32 %v1417_v20, %v1417_v20  ;;  %v605_v34 = vmul.f32 %v1421_v26, %v1421_v26 }
 0x1b5   : > { %v556_v21 = vpop.xlane.xlu0 %555  ;;  %v560_v22 = vpop.xlane.xlu1 %559 }
 0x1b6   : > { %v593_v29 = vmul.f32 0.0051020407, %v556_v21  ;;  %v594_v50 = vmul.f32 0.0051020407, %v560_v22 }
 0x1b8   : > { %v609_v31 = vsub.f32 %v593_v29, %v601_v25  ;;  %v645_v25 = vld [vmem:[%s1435_s20 + $0x20] sm:$0xff] }
 0x1b9   : > { %v572_v32 = vpop.xlane.xlu0 %571  ;;  %v576_v33 = vpop.xlane.xlu1 %575 }
 0x1ba   : > { %v617_v35 = vmax.f32 %v609_v31, 0.0  ;;  %v597_v36 = vmul.f32 0.0051020407, %v572_v32  ;;  %v598_v37 = vmul.f32 0.0051020407, %v576_v33 }
 0x1bc   : > { %v625_v38 = vadd.f32 0.001, %v617_v35  ;;  %v613_v39 = vsub.f32 %v597_v36, %v605_v34  ;;  %v614_v41 = vsub.f32 %v598_v37, %v606_v30 }
 0x1bd   : > { %v512_v43 = vpop.xlane.xlu0 %511  ;;  %v516_v44 = vpop.xlane.xlu1 %515 }
 0x1be   : > { %1022 = vrsqrt.f32 %v625_v38  ;;  %v621_v47 = vmax.f32 %v613_v39, 0.0  ;;  %v622_v48 = vmax.f32 %v614_v41, 0.0  ;;  %v586_v49 = vmul.f32 0.0051020407, %v512_v43  ;;  %v642_v39 = vld [vmem:[%s1435_s20 + $0x8] sm:$0xff] }
 0x1bf   : > { %v1428_v53 = vmul.f32 0.0051020407, %v516_v44  ;;  %v646_v44 = vld [vmem:[%s1435_s20 + $0x28] sm:$0xff] }
 0x1c0   : > { %v629_v51 = vadd.f32 0.001, %v621_v47  ;;  %v602_v52 = vmul.f32 %v586_v49, %v586_v49  ;;  %v630_v58 = vadd.f32 0.001, %v622_v48 }
 0x1c1   : > { %v532_v54 = vpop.xlane.xlu0 %531  ;;  %v520_v57 = vpop.xlane.xlu1 %519  ;;  %v603_v0 = vmul.f32 %v1428_v53, %v1428_v53 }
 0x1c2   : > { %1024 = vrsqrt.f32 %v629_v51  ;;  %v610_v61 = vsub.f32 %v594_v50, %v602_v52  ;;  %v1437_v63 = vmul.f32 0.0051020407, %v520_v57  ;;  %v1442_v5 = vmul.f32 0.0051020407, %v532_v54 }
 0x1c3   : > { %1026 = vrsqrt.f32 %v630_v58  ;;  %v658_v58 = vld [vmem:[%s1460_s23 + $0x8] sm:$0xff] }
 0x1c4   : > { %v618_v62 = vmax.f32 %v610_v61, 0.0  ;;  %v604_v8 = vmul.f32 %v1437_v63, %v1437_v63  ;;  %v607_v18 = vmul.f32 %v1442_v5, %v1442_v5 }
 0x1c5   : > { %v564_v1 = vpop.xlane.xlu0 %563  ;;  %v536_v2 = vpop.xlane.xlu1 %535 }
 0x1c6   : > { %v626_v4 = vadd.f32 0.001, %v618_v62  ;;  %v595_v6 = vmul.f32 0.0051020407, %v564_v1  ;;  %v1446_v9 = vmul.f32 0.0051020407, %v536_v2 }
 0x1c8   : > { %v1023_v7 = vpop.eup %1022  ;;  %1028 = vrsqrt.f32 %v626_v4  ;;  %v611_v10 = vsub.f32 %v595_v6, %v603_v0  ;;  %v608_v30 = vmul.f32 %v1446_v9, %v1446_v9  ;;  %v657_v4 = vld [vmem:[%s1460_s23] sm:$0xff] }
 0x1c9   : > { %v580_v15 = vpop.xlane.xlu0 %579  ;;  %v568_v16 = vpop.xlane.xlu1 %567  ;;  %v649_v17 = vmul.f32 %v1023_v7, %v641_v3  ;;  %v662_v3 = vld [vmem:[%s1460_s23 + $0x28] sm:$0xff] }
 0x1ca   : > { %v599_v21 = vmul.f32 0.0051020407, %v580_v15  ;;  %v596_v22 = vmul.f32 0.0051020407, %v568_v16  ;;  %v619_v32 = vmax.f32 %v611_v10, 0.0  ;;  %v661_v10 = vld [vmem:[%s1460_s23 + $0x20] sm:$0xff] }
 0x1cb   : > { %683 = vperm.xlu0 %1016, %v649_v17   ;;  %v665_v2 = vmul.f32 %v649_v17, %v1415_v19  ;;  %v648_v19 = vld [vmem:[%s1435_s20 + $0x38] sm:$0xff] }
 0x1cc   : > { %v1025_v29 = vpop.eup %1024  ;;  %v612_v31 = vsub.f32 %v596_v22, %v604_v8  ;;  %v615_v35 = vsub.f32 %v599_v21, %v607_v18  ;;  %v627_v47 = vadd.f32 0.001, %v619_v32  ;;  %v644_v8 = vld [vmem:[%s1435_s20 + $0x18] sm:$0xff] }
 0x1cd   : > { %v584_v33 = vpop.xlane.xlu1 %583  ;;  %v653_v34 = vmul.f32 %v1025_v29, %v645_v25  ;;  %v1027_v38 = vpop.eup %1026  ;;  %v673_v6 = vsub.f32 %v657_v4, %v665_v2  ;;  %v660_v18 = vld [vmem:[%s1460_s23 + $0x18] sm:$0xff]  ;;  %v643_v25 = vld [vmem:[%s1435_s20 + $0x10] sm:$0xff] }
 0x1ce   : > { %v620_v36 = vmax.f32 %v612_v31, 0.0  ;;  %v600_v37 = vmul.f32 0.0051020407, %v584_v33  ;;  %v623_v50 = vmax.f32 %v615_v35, 0.0  ;;  %v654_v54 = vmul.f32 %v1027_v38, %v646_v44 }
 0x1cf   : > { %703 = vperm.xlu1 %1017, %v653_v34   ;;  %v669_v7 = vmul.f32 %v653_v34, %v1421_v26  ;;  %v647_v34 = vld [vmem:[%s1435_s20 + $0x30] sm:$0xff] }
 0x1d0   : > { %v628_v41 = vadd.f32 0.001, %v620_v36  ;;  %v616_v43 = vsub.f32 %v600_v37, %v608_v30  ;;  %v631_v62 = vadd.f32 0.001, %v623_v50  ;;  %v670_v1 = vmul.f32 %v654_v54, %v1417_v20  ;;  %v664_v30 = vld [vmem:[%s1460_s23 + $0x38] sm:$0xff]  ;;  %v659_v37 = vld [vmem:[%s1460_s23 + $0x10] sm:$0xff] }
 0x1d1   : > { %v677_v17 = vsub.f32 %v661_v10, %v669_v7 }
 0x1d2   : > { %v1029_v48 = vpop.eup %1028  ;;  %v624_v51 = vmax.f32 %v616_v43, 0.0  ;;  %1030 = vrsqrt.f32 %v628_v41  ;;  %v663_v41 = vld [vmem:[%s1460_s23 + $0x30] sm:$0xff] }
 0x1d3   : > { %v650_v52 = vmul.f32 %v1029_v48, %v642_v39  ;;  %1032 = vrsqrt.f32 %v627_v47 }
 0x1d4   : > { %v632_v57 = vadd.f32 0.001, %v624_v51 }
 0x1d5   : > { %v666_v61 = vmul.f32 %v650_v52, %v586_v49  ;;  %688 = vperm.xlu1 %1017, %v650_v52   ;;  %v678_v49 = vsub.f32 %v662_v3, %v670_v1 }
 0x1d6   : > { %1034 = vrsqrt.f32 %v632_v57 }
 0x1d7   : > { %v674_v0 = vsub.f32 %v658_v58, %v666_v61  ;;  %1036 = vrsqrt.f32 %v631_v62 }
 0x1d9   : > { %744 = vperm.xlu0 %1016, %v674_v0   ;;  %708 = vperm.xlu1 %1017, %v654_v54  }
 0x1dc   : > { %v1031_v15 = vpop.eup %1030 }
 0x1dd   : > { %764 = vperm.xlu0 %1016, %v678_v49   ;;  %739 = vperm.xlu1 %1017, %v673_v6   ;;  %v652_v20 = vmul.f32 %v1031_v15, %v644_v8  ;;  %v1033_v16 = vpop.eup %1032 }
 0x1de   : > { %v651_v31 = vmul.f32 %v1033_v16, %v643_v25 }
 0x1df   : > { %v668_v22 = vmul.f32 %v652_v20, %v1437_v63 }
 0x1e0   : > { %v1035_v21 = vpop.eup %1034  ;;  %v667_v63 = vmul.f32 %v651_v31, %v1428_v53 }
 0x1e1   : > { %759 = vperm.xlu1 %1017, %v677_v17   ;;  %v656_v29 = vmul.f32 %v1035_v21, %v648_v19  ;;  %v676_v26 = vsub.f32 %v660_v18, %v668_v22  ;;  %v1037_v33 = vpop.eup %1036 }
 0x1e2   : > { %v655_v36 = vmul.f32 %v1037_v33, %v647_v34  ;;  %v675_v38 = vsub.f32 %v659_v37, %v667_v63 }
 0x1e3   : > { %v672_v32 = vmul.f32 %v656_v29, %v1446_v9  ;;  %754 = vperm.xlu0 %1016, %v676_v26  }
 0x1e4   : > { %v671_v39 = vmul.f32 %v655_v36, %v1442_v5 }
 0x1e5   : > { %693 = vperm.xlu1 %1017, %v651_v31   ;;  %v680_v35 = vsub.f32 %v664_v30, %v672_v32 }
 0x1e6   : > { %v679_v9 = vsub.f32 %v663_v41, %v671_v39 }
 0x1e7   : > { %774 = vperm.xlu0 %1016, %v680_v35  }
 0x1e9   : > { %713 = vperm.xlu1 %1017, %v655_v36  }
 0x1ed   : > { %698 = vperm.xlu1 %1017, %v652_v20  }
 0x1f1   : > { %718 = vperm.xlu1 %1017, %v656_v29  }
 0x1f5   : > { %749 = vperm.xlu1 %1017, %v675_v38  }
 0x1f9   : > { %769 = vperm.xlu1 %1017, %v679_v9  }
 0x24a   : > { %v684_v44 = vpop.permute.xlu0 %683 }
 0x24b   : > { %v721_v54 = vmul.f32 %v684_v44, %v1319_v11 }
 0x24e   : > { %v704_v43 = vpop.permute.xlu1 %703 }
 0x24f   : > { %v729_v11 = vmul.f32 %v704_v43, %v1321_v12 }
 0x254   : > { %v689_v47 = vpop.permute.xlu1 %688 }
 0x255   : > { %v723_v48 = vmul.f32 %v689_v47, %v1343_v24  ;;  %v724_v50 = vmul.f32 %v689_v47, %v1349_v28  ;;  %v722_v24 = vmul.f32 %v684_v44, %v1323_v13  ;;  %v730_v13 = vmul.f32 %v704_v43, %v1325_v14 }
 0x258   : > { %v745_v53 = vpop.permute.xlu0 %744  ;;  %v709_v5 = vpop.permute.xlu1 %708 }
 0x259   : > { %v779_v51 = vadd.f32 %v745_v53, %v723_v48  ;;  %v780_v52 = vadd.f32 %v745_v53, %v724_v50  ;;  %v731_v28 = vmul.f32 %v709_v5, %v1341_v23  ;;  %v732_v57 = vmul.f32 %v709_v5, %v1347_v27 }
 0x25b   : > { %795 = vst [vmem:[%s1488_s27 + $0x10] sm:$0xff] %v779_v51  ;;  %796 = vst.msk [vmem:[%s1488_s27 + $0x18] sm:$0xff] %vm504_vm0, %v780_v52 }
 0x25c   : > { %v765_v58 = vpop.permute.xlu0 %764  ;;  %v740_v61 = vpop.permute.xlu1 %739 }
 0x25d   : > { %v787_v62 = vadd.f32 %v765_v58, %v731_v28  ;;  %v788_v0 = vadd.f32 %v765_v58, %v732_v57  ;;  %v777_v1 = vadd.f32 %v740_v61, %v721_v54  ;;  %v778_v2 = vadd.f32 %v740_v61, %v722_v24 }
 0x25f   : > { %803 = vst [vmem:[%s1488_s27 + $0x50] sm:$0xff] %v787_v62  ;;  %804 = vst.msk [vmem:[%s1488_s27 + $0x58] sm:$0xff] %vm504_vm0, %v788_v0 }
 0x260   : > { %793 = vst [vmem:[%s1488_s27] sm:$0xff] %v777_v1  ;;  %794 = vst.msk [vmem:[%s1488_s27 + $0x8] sm:$0xff] %vm504_vm0, %v778_v2  ;;  %v760_v23 = vpop.permute.xlu1 %759 }
 0x261   : > { %v785_v27 = vadd.f32 %v760_v23, %v729_v11  ;;  %v786_v3 = vadd.f32 %v760_v23, %v730_v13 }
 0x262   : > { %v755_v6 = vpop.permute.xlu0 %754 }
 0x263   : > { %801 = vst [vmem:[%s1488_s27 + $0x40] sm:$0xff] %v785_v27  ;;  %802 = vst.msk [vmem:[%s1488_s27 + $0x48] sm:$0xff] %vm504_vm0, %v786_v3 }
 0x264   : > { %v694_v4 = vpop.permute.xlu1 %693 }
 0x265   : > { %v725_v17 = vmul.f32 %v694_v4, %v1366_v40 }
 0x266   : > { %v775_v16 = vpop.permute.xlu0 %774 }
 0x268   : > { %v714_v49 = vpop.permute.xlu1 %713 }
 0x269   : > { %v733_v29 = vmul.f32 %v714_v49, %v1369_v42 }
 0x26c   : > { %v699_v12 = vpop.permute.xlu1 %698 }
 0x26d   : > { %v727_v14 = vmul.f32 %v699_v12, %v1389_v55  ;;  %v728_v7 = vmul.f32 %v699_v12, %v1395_v59  ;;  %v726_v55 = vmul.f32 %v694_v4, %v1371_v45 }
 0x26f   : > { %v783_v8 = vadd.f32 %v755_v6, %v727_v14  ;;  %v784_v10 = vadd.f32 %v755_v6, %v728_v7 }
 0x270   : > { %v719_v15 = vpop.permute.xlu1 %718 }
 0x271   : > { %799 = vst [vmem:[%s1488_s27 + $0x30] sm:$0xff] %v783_v8  ;;  %800 = vst.msk [vmem:[%s1488_s27 + $0x38] sm:$0xff] %vm504_vm0, %v784_v10  ;;  %v735_v20 = vmul.f32 %v719_v15, %v1391_v56  ;;  %v736_v19 = vmul.f32 %v719_v15, %v1397_v60  ;;  %v734_v56 = vmul.f32 %v714_v49, %v1373_v46 }
 0x273   : > { %v791_v59 = vadd.f32 %v775_v16, %v735_v20  ;;  %v792_v18 = vadd.f32 %v775_v16, %v736_v19 }
 0x274   : > { %v750_v21 = vpop.permute.xlu1 %749 }
 0x275   : > { %807 = vst [vmem:[%s1488_s27 + $0x70] sm:$0xff] %v791_v59  ;;  %808 = vst.msk [vmem:[%s1488_s27 + $0x78] sm:$0xff] %vm504_vm0, %v792_v18  ;;  %v781_v22 = vadd.f32 %v750_v21, %v725_v17  ;;  %v782_v25 = vadd.f32 %v750_v21, %v726_v55 }
 0x277   : > { %797 = vst [vmem:[%s1488_s27 + $0x20] sm:$0xff] %v781_v22  ;;  %798 = vst.msk [vmem:[%s1488_s27 + $0x28] sm:$0xff] %vm504_vm0, %v782_v25 }
 0x278   : > { %v770_v40 = vpop.permute.xlu1 %769 }
 0x279   : > { %v789_v60 = vadd.f32 %v770_v40, %v733_v29  ;;  %v790_v26 = vadd.f32 %v770_v40, %v734_v56 }
 0x27b   : > { %805 = vst [vmem:[%s1488_s27 + $0x60] sm:$0xff] %v789_v60  ;;  %806 = vst.msk [vmem:[%s1488_s27 + $0x68] sm:$0xff] %vm504_vm0, %v790_v26 }
 0x27c PF: > { %s15_s18 = sadd.s32 1, %s1044_s18  }
 0x27d   : > { %p12_p4 = scmp.ge.s32.totalorder %s15_s18, 4  }
 0x27f   :  { %14 = sbr.rel (!%p12_p4) target bundleno = 1 (0x1), region = 76 }

</bundles_post_ra>
